<compile_context>
chip_gen: v5e
topology: v5e:2x2
jax: 0.10.0
libtpu: 0.0.40
codegen_flags: <defaults>
</compile_context>

<pallas_src>
import jax
import jax.numpy as jnp
from jax.experimental import pallas as pl
from jax.experimental.pallas import tpu as pltpu


def _prototype_kernel(z_ref, mu_ref, mu_nt_ref, out_ref):
    # z_ref:     (TM, Z)  f32   current row tile of z
    # mu_ref:    (P, Z)   bf16  un-normalized mu_proxy (resident across grid)
    # mu_nt_ref: (Z, P)   bf16  pre-normalized, pre-transposed mu_proxy
    # out_ref:   (TM, Z)        dynamic_mu rows (f32 or bf16)
    z = z_ref[...].astype(jnp.float32)
    mu = mu_ref[...]
    mu_nt = mu_nt_ref[...]

    # torch F.normalize: x / max(||x||_2, eps) == x * min(rsqrt(sum x^2), 1/eps)
    sumsq = jnp.sum(z * z, axis=-1, keepdims=True)
    inv_norm = jnp.minimum(jax.lax.rsqrt(sumsq), jnp.float32(1e12))
    z_n = z * inv_norm                                          # (TM, Z) f32

    # att_scores = z_norm @ mu_proxy_norm.T -> (TM, P); bf16 operands, f32 acc
    scores = jnp.dot(z_n.astype(jnp.bfloat16), mu_nt,
                     preferred_element_type=jnp.float32)

    # softmax over proxies (f32 math, approx reciprocal on the EUP slot)
    m = jnp.max(scores, axis=-1, keepdims=True)
    e = jnp.exp(scores - m)
    denom = jnp.sum(e, axis=-1, keepdims=True)
    att = e * pl.reciprocal(denom, approx=True)                 # (TM, P) f32

    # dynamic_mu = att_weights @ mu_proxy -> (TM, Z); bf16 operands, f32 acc
    dyn = jnp.dot(att.astype(jnp.bfloat16), mu,
                  preferred_element_type=jnp.float32)
    out_ref[...] = dyn.astype(out_ref.dtype)


def _round_up(n, m):
    return ((n + m - 1) // m) * m


def _choose_row_tile(R):
    """Row tile: large enough to amortize the ~0.35 us/step overhead and keep
    HBM near its roofline (512-1024 rows), capped so the row grid keeps at
    least 2 steps (both v7x TensorCores busy) and ideally >= 4 (pipelining)."""
    if R <= 8:
        return 8                                    # single (possibly ragged) block
    tm = min(1024, _round_up(pl.cdiv(R, 4), 8))     # aim for ~4+ grid steps
    tm = min(tm, _round_up(pl.cdiv(R, 2), 8))       # never fewer than 2 steps
    return max(tm, 8)


def prototype_forward(z, proxies, z_dim, out_dtype=jnp.float32):
    """z: (B, S, z_dim) f32; proxies: (2*num_classes, 2*z_dim) f32.

    Set out_dtype=jnp.bfloat16 to halve the HBM writeback (the result already
    comes from a bf16 x bf16 MXU matmul, so the extra precision loss is small).
    """
    B, S, Z = z.shape
    assert Z == z_dim
    eps = jnp.float32(1e-12)

    # Tiny (P, Z) parameter prep hoisted out of the kernel (glue, runs once).
    mu = proxies[:, :z_dim]                                     # (P, Z) f32
    mu_norm = jnp.maximum(
        jnp.sqrt(jnp.sum(mu * mu, axis=-1, keepdims=True)), eps)
    mu_nt = (mu / mu_norm).T.astype(jnp.bfloat16)               # (Z, P) bf16
    mu_bf = mu.astype(jnp.bfloat16)                             # (P, Z) bf16
    P = mu.shape[0]

    # Collapse (B, S) into rows.  No padding: pl.cdiv grid + ragged last block
    # (rows are independent; out-of-bounds rows of the last block are clipped
    # on write, and garbage rows cannot contaminate valid rows).
    R = B * S
    z2 = z.reshape(R, Z)
    TM = _choose_row_tile(R)
    grid = (pl.cdiv(R, TM),)

    out_bytes = jnp.dtype(out_dtype).itemsize
    flops = 4 * R * P * Z                     # two matmuls
    transcendentals = R * (P + 2)             # exp per score + rsqrt + recip
    bytes_accessed = R * Z * 4 + R * Z * out_bytes + 2 * P * Z * 2

    out = pl.pallas_call(
        _prototype_kernel,
        out_shape=jax.ShapeDtypeStruct((R, Z), out_dtype),
        grid_spec=pltpu.PrefetchScalarGridSpec(
            num_scalar_prefetch=0,
            grid=grid,
            in_specs=[
                pl.BlockSpec((TM, Z), lambda i: (i, 0)),
                # Constant block index -> Pallas keeps these resident; no
                # per-step re-DMA of the tiny (P, Z) parameter tensors.
                pl.BlockSpec((P, Z), lambda i: (0, 0)),
                pl.BlockSpec((Z, P), lambda i: (0, 0)),
            ],
            out_specs=pl.BlockSpec((TM, Z), lambda i: (i, 0)),
        ),
        compiler_params=pltpu.CompilerParams(
            dimension_semantics=("parallel",),      # shard rows across TCs
            vmem_limit_bytes=32 * 1024 * 1024),     # headroom for TM up to 1024
        cost_estimate=pl.CostEstimate(
            flops=int(flops),
            transcendentals=int(transcendentals),
            bytes_accessed=int(bytes_accessed)),
    )(z2, mu_bf, mu_nt)

    return out.reshape(B, S, Z)


def _xavier_uniform(key, shape, gain=1.0):
    fan_out, fan_in = shape  # torch nn.Parameter convention: (rows, cols)
    bound = gain * jnp.sqrt(6.0 / (fan_in + fan_out))
    return jax.random.uniform(key, shape, jnp.float32, -bound, bound)


def prototype_reference(z, proxies, z_dim):
    mu = proxies[:, :z_dim]
    zn = z / jnp.maximum(jnp.linalg.norm(z, axis=-1, keepdims=True), 1e-12)
    mun = mu / jnp.maximum(jnp.linalg.norm(mu, axis=-1, keepdims=True), 1e-12)
    scores = jnp.einsum("bsz,pz->bsp", zn, mun)
    att = jax.nn.softmax(scores, axis=-1)
    return jnp.einsum("bsp,pz->bsz", att, mu)


if __name__ == "__main__":
    # Small shapes, module-consistent: batch=2, seq=8, z_dim=256 (module
    # default, multiple of 128 -> lane-dense stores), num_classes=4.
    B, S, Z, C = 2, 8, 256, 4

    key = jax.random.PRNGKey(0)
    k_x, k_p = jax.random.split(key)

    x = jax.random.normal(k_x, (B, S, Z), dtype=jnp.float32)   # encoder_result(x) == x
    proxies = _xavier_uniform(k_p, (C * 2, Z * 2), gain=1.0)   # nn.Parameter init

    out = prototype_forward(x, proxies, z_dim=Z)
    out = jax.block_until_ready(out)

    ref = prototype_reference(x, proxies, z_dim=Z)
    assert out.shape == (B, S, Z)
    # bf16 matmul operands + approx reciprocal -> looser tolerance than pure f32
    assert jnp.allclose(out, ref, atol=2e-2, rtol=2e-2), (
        float(jnp.max(jnp.abs(out - ref))))

    print("KERNEL_OK")
</pallas_src>

<mosaic_0001>
module attributes {stable_mosaic.version = 11 : i64} {
  func.func @_prototype_kernel(%arg0: i32, %arg1: memref<8x256xf32, #tpu.memory_space<vmem>>, %arg2: memref<8x256xbf16, #tpu.memory_space<vmem>>, %arg3: memref<256x8xbf16, #tpu.memory_space<vmem>>, %arg4: memref<8x256xf32, #tpu.memory_space<vmem>>) attributes {dimension_semantics = [#tpu.dimension_semantics<parallel>], iteration_bounds = array<i64: 2>, scalar_prefetch = 0 : i64, scratch_operands = 0 : i64, tpu.core_type = #tpu.core_type<tc>, window_params = [{transform_indices = @transform_0, window_bounds = array<i64: 8, 256>}, {pipeline_mode = #tpu.pipeline_mode<synchronous>, transform_indices = @transform_1, window_bounds = array<i64: 8, 256>}, {pipeline_mode = #tpu.pipeline_mode<synchronous>, transform_indices = @transform_2, window_bounds = array<i64: 256, 8>}, {transform_indices = @transform_3, window_bounds = array<i64: 8, 256>}]} {
    %c0 = arith.constant 0 : index
    %c0_0 = arith.constant 0 : index
    %0 = vector.load %arg1[%c0, %c0_0] : memref<8x256xf32, #tpu.memory_space<vmem>>, vector<8x256xf32>
    %c0_1 = arith.constant 0 : index
    %c0_2 = arith.constant 0 : index
    %1 = vector.load %arg2[%c0_1, %c0_2] : memref<8x256xbf16, #tpu.memory_space<vmem>>, vector<8x256xbf16>
    %c0_3 = arith.constant 0 : index
    %c0_4 = arith.constant 0 : index
    %2 = vector.load %arg3[%c0_3, %c0_4] : memref<256x8xbf16, #tpu.memory_space<vmem>>, vector<256x8xbf16>
    %3 = arith.mulf %0, %0 : vector<8x256xf32>
    %cst = arith.constant dense<0.000000e+00> : vector<8xf32>
    %4 = vector.multi_reduction <add>, %3, %cst [1] : vector<8x256xf32> to vector<8xf32>
    %5 = vector.shape_cast %4 : vector<8xf32> to vector<8x1xf32>
    %6 = math.rsqrt %5 : vector<8x1xf32>
    %cst_5 = arith.constant 9.99999995E+11 : f32
    %7 = vector.broadcast %cst_5 : f32 to vector<8x1xf32>
    %8 = arith.minimumf %6, %7 : vector<8x1xf32>
    %9 = vector.broadcast %8 : vector<8x1xf32> to vector<8x256xf32>
    %10 = arith.mulf %0, %9 : vector<8x256xf32>
    %11 = arith.truncf %10 : vector<8x256xf32> to vector<8x256xbf16>
    %cst_6 = arith.constant dense<0.000000e+00> : vector<8x8xf32>
    %12 = tpu.matmul %11, %2, %cst_6 {dimension_numbers = #tpu.dot_dimension_numbers<[1], [0], [0], [1], [0, 0, 1, 1], [], []>} : vector<8x256xbf16>, vector<256x8xbf16>, vector<8x8xf32> -> vector<8x8xf32>
    %cst_7 = arith.constant dense<0xFF800000> : vector<8xf32>
    %13 = vector.multi_reduction <maximumf>, %12, %cst_7 [1] : vector<8x8xf32> to vector<8xf32>
    %14 = vector.shape_cast %13 : vector<8xf32> to vector<8x1xf32>
    %15 = vector.broadcast %14 : vector<8x1xf32> to vector<8x8xf32>
    %16 = arith.subf %12, %15 : vector<8x8xf32>
    %17 = math.exp %16 : vector<8x8xf32>
    %cst_8 = arith.constant dense<0.000000e+00> : vector<8xf32>
    %18 = vector.multi_reduction <add>, %17, %cst_8 [1] : vector<8x8xf32> to vector<8xf32>
    %19 = vector.shape_cast %18 : vector<8xf32> to vector<8x1xf32>
    %20 = tpu.reciprocal %19 {approx = true} : vector<8x1xf32> -> vector<8x1xf32>
    %21 = vector.broadcast %20 : vector<8x1xf32> to vector<8x8xf32>
    %22 = arith.mulf %17, %21 : vector<8x8xf32>
    %23 = arith.truncf %22 : vector<8x8xf32> to vector<8x8xbf16>
    %cst_9 = arith.constant dense<0.000000e+00> : vector<8x256xf32>
    %24 = tpu.matmul %23, %1, %cst_9 {dimension_numbers = #tpu.dot_dimension_numbers<[1], [0], [0], [1], [0, 0, 1, 1], [], []>} : vector<8x8xbf16>, vector<8x256xbf16>, vector<8x256xf32> -> vector<8x256xf32>
    %c0_10 = arith.constant 0 : index
    %c0_11 = arith.constant 0 : index
    %25 = vector.load %arg4[%c0_10, %c0_11] : memref<8x256xf32, #tpu.memory_space<vmem>>, vector<8x256xf32>
    tpu.vector_store %arg4[%c0_10, %c0_11], %24 {strides = array<i32>} : memref<8x256xf32, #tpu.memory_space<vmem>>, vector<8x256xf32>,
    return
  }
  func.func @transform_0(%arg0: i32) -> (i32, i32) {
    %c0_i32 = arith.constant 0 : i32
    %c0_i32_0 = arith.constant 0 : i32
    return %arg0, %c0_i32 : i32, i32
  }
  func.func @transform_1(%arg0: i32) -> (i32, i32) {
    %c0_i32 = arith.constant 0 : i32
    %c0_i32_0 = arith.constant 0 : i32
    %c0_i32_1 = arith.constant 0 : i32
    return %c0_i32, %c0_i32_0 : i32, i32
  }
  func.func @transform_2(%arg0: i32) -> (i32, i32) {
    %c0_i32 = arith.constant 0 : i32
    %c0_i32_0 = arith.constant 0 : i32
    %c0_i32_1 = arith.constant 0 : i32
    return %c0_i32, %c0_i32_0 : i32, i32
  }
  func.func @transform_3(%arg0: i32) -> (i32, i32) {
    %c0_i32 = arith.constant 0 : i32
    %c0_i32_0 = arith.constant 0 : i32
    return %arg0, %c0_i32 : i32, i32
  }
}

</mosaic_0001>

<bundles_post_ra>
// kernel: tpu_custom_call.1
= control target key start
LH: loop header
LB: loop body
LE: loop exit
PB: predicated region body
PF: predicated region fallthrough
CT: control target
= control target key end

     0   :  { %8 = vsyncpa [#allocation3], 0  ;;  %s844_s0 = inlined_call_operand.vmem [shape: f32[16,256], index: 0, kind: input, shape index: {}]   ;;  %s845_s1 = inlined_call_operand.vmem [shape: bf16[8,256], index: 1, kind: input, shape index: {}]   ;;  %s846_s2 = inlined_call_operand.vmem [shape: bf16[256,8], index: 2, kind: input, shape index: {}]   ;;  %s847_s3 = inlined_call_operand.hbm [shape: f32[16,256], index: 3, kind: output, shape index: {}]  }
   0x1   :  { %10 = vsyncpa [#allocation3 + $0x1], 0  ;;  %s704_s12 = smov 0   ;;  %s706_s13 = smov 0  }
   0x2   :  { %s708_s14 = smov 0   ;;  %s710_s15 = smov 0  }
   0x3 LB: > { %s725_s16 = sadd.s32 4294967295, %s682_s15   ;;  %s479_s17 = sadd.s32 4294967294, %s682_s15   ;;  %s682_s15 = sphi %s710_s15, %s853_s15   ;;  %s678_s14 = sphi %s708_s14, %s852_s14   ;;  %s674_s13 = sphi %s706_s13, %s851_s13   ;;  %s670_s12 = sphi %s704_s12, %s850_s12  }
   0x4   : > { %s729_s18 = sadd.s32 1, %s682_s15   ;;  %s91_s19 = sadd.s32 1, %s678_s14 }
   0x5   : > { %s88_s20 = ssub.s32 %s682_s15, %s729_s18  ;;  %p101_p0 = scmp.ne.s32.totalorder %s678_s14, %s674_s13 }
   0x6   : > { %p89_p1 = scmp.eq.s32.totalorder %s88_s20, 0  ;;  %p102_p2 = scmp.eq.s32.totalorder %s725_s16, 1 }
   0x7   : > { %p107_p3 = scmp.ne.s32.totalorder %s674_s13, %s670_s12  ;;  %p108_p4 = scmp.eq.s32.totalorder %s479_s17, 1 }
   0x8   : > { %s740_s21 = scalar_select %p89_p1, %s678_s14, %s91_s19  }
   0x9   : > { %p742_p5 = por %p102_p2, %p101_p0  ;;  %p746_p6 = por %p108_p4, %p107_p3 }
   0xa   : > { %p482_p7 = scmp.ge.s32.totalorder %s682_s15, 1  ;;  %p140_p8 = scmp.lt.s32.totalorder %s682_s15, 3 }
   0xc   : > { %p141_p9 = pnand %p482_p7, %p140_p8 }
   0xd   : > { %p164_p10 = scmp.lt.s32.totalorder (!%p141_p9), %s725_s16, 1  ;;  %s161_s27 = sand.u32 (!%p141_p9), 1, %s674_s13  }
   0xe   : > { %144 = sbr.rel (%p141_p9) target bundleno = 692 (0x2b4), region = 32  ;;  %s483_s29 = sshll.u32 (!%p141_p9), %s161_s27, 4 }
   0xf   : > { %s640_s19 = scalar_lea.hbm (!%p141_p9), %s847_s3, 32 }
  0x13   : > { %v565_v0 = vld [vmem:[%s846_s2 + $0x38] sm:$0xff]  ;;  %s165_s28 = scalar_select %p164_p10, %s725_s16, 1  ;;  %v564_v2 = vld [vmem:[%s846_s2 + $0x30] sm:$0xff]  ;;  %v563_v9 = vld [vmem:[%s846_s2 + $0x28] sm:$0xff]  ;;  %vm347_vm3 = vcmask 64512   ;;  %vm368_vm4 = vcmask 1043456  }
  0x14   : > { %v573_v1 = vld [vmem:[%s846_s2 + $0x78] sm:$0xff]  ;;  %321 = vmatpush.bf16.msra.mxu0 %v565_v0  ;;  %v572_v3 = vld [vmem:[%s846_s2 + $0x70] sm:$0xff]  ;;  %v571_v10 = vld [vmem:[%s846_s2 + $0x68] sm:$0xff] }
  0x15   : > { %334 = vmatpush.bf16.msra.mxu1 %v573_v1  ;;  %s557_s6 = sshll.u32 %s165_s28, 4  ;;  %v562_v11 = vld [vmem:[%s846_s2 + $0x20] sm:$0xff]  ;;  %v561_v13 = vld [vmem:[%s846_s2 + $0x18] sm:$0xff]  ;;  %v560_v15 = vld [vmem:[%s846_s2 + $0x10] sm:$0xff]  ;;  %s574_s28 = sshll.u32 %s725_s16, 4 }
  0x16   : > { %s168_s9 = scalar_lea.vmem %s844_s0, %s557_s6  ;;  %v570_v12 = vld [vmem:[%s846_s2 + $0x60] sm:$0xff]  ;;  %v569_v14 = vld [vmem:[%s846_s2 + $0x58] sm:$0xff]  ;;  %v568_v16 = vld [vmem:[%s846_s2 + $0x50] sm:$0xff]  ;;  %s415_s5 = scalar_lea.hbm %s847_s3, %s574_s28 }
  0x17   : > { %v170_v4 = vld [vmem:[%s168_s9] sm:$0xff]  ;;  %v171_v5 = vld [vmem:[%s168_s9 + $0x8] sm:$0xff]  ;;  %s163_s6 = scalar_lea.vmem [#allocation2], %s483_s29  ;;  %s419_s8 = sshll.u32 %s415_s5, 4  ;;  %s420_s8 = int_to_ptr.hbm [resolvable:$true] %s419_s8 }
  0x18   : > { %322 = vmatpush.bf16.msra.mxu0 %v564_v2  ;;  %v205_v6 = vmul.f32 %v170_v4, %v170_v4  ;;  %v206_v7 = vmul.f32 %v171_v5, %v171_v5  ;;  %v559_v17 = vld [vmem:[%s846_s2 + $0x8] sm:$0xff]  ;;  %v558_v19 = vld [vmem:[%s846_s2] sm:$0xff]  ;;  %s417_s7 = sshll.u32 %s163_s6, 4  ;;  %s404_s9 = scalar_lea.sflag [#allocation3], %s161_s27  ;;  %s418_s7 = int_to_ptr.vmem [resolvable:$true] %s417_s7 }
  0x19   : > { %335 = vmatpush.bf16.msra.mxu1 %v572_v3  ;;  %v567_v18 = vld [vmem:[%s846_s2 + $0x48] sm:$0xff]  ;;  %v566_v20 = vld [vmem:[%s846_s2 + $0x40] sm:$0xff]  ;;  %s634_s10 = sshra.s32 %s420_s8, 4  ;;  %s635_s10 = int_to_ptr.hbm [resolvable:$true] %s634_s10 }
  0x1a   : > { %v207_v8 = vadd.f32 %v206_v7, %v205_v6  ;;  %v172_v45 = vld [vmem:[%s845_s1] sm:$0xff]  ;;  %s636_s11 = scalar_lea.hbm %s635_s10, 16  ;;  %p641_p0 = scmp.lt.s32.totalorder %s635_s10, %s847_s3 }
  0x1b   : > { %v361_v46 = vunpack.c.l.b16 %v172_v45  ;;  %v362_v47 = vunpack.c.h.b16 %v172_v45  ;;  %p637_p11 = scmp.ne.s32.totalorder %s635_s10, %s636_s11  ;;  %p642_p1 = scmp.lt.s32.totalorder %s640_s19, %s636_s11 }
  0x1c   : > { %208 = vadd.xlane.f32.xlu0 %v207_v8  ;;  %323 = vmatpush.bf16.msra.mxu0 %v563_v9 }
  0x1d   : > { %336 = vmatpush.bf16.msra.mxu1 %v571_v10  ;;  %v363_v48 = vpack.c.b16 %v361_v46, %v361_v46  ;;  %v364_v49 = vpack.c.b16 %v362_v47, %v362_v47  ;;  %p638_p12 = pnand %p637_p11, %p742_p5  ;;  %p643_p2 = por %p642_p1, %p641_p0 }
  0x1f   : > { %v370_v50 = vsel %vm368_vm4, %v363_v48, 0  ;;  %v373_v51 = vsel %vm368_vm4, %v364_v49, 0  ;;  %p639_p13 = pneg %p638_p12 }
  0x20   : > { %324 = vmatpush.bf16.msra.mxu0 %v562_v11  ;;  %382 = vmatpush.bf16.msra.mxu2 %v370_v50 }
  0x21   : > { %337 = vmatpush.bf16.msra.mxu1 %v570_v12  ;;  %395 = vmatpush.bf16.msra.mxu3 %v373_v51  ;;  %p644_p3 = pnand %p643_p2, %p639_p13 }
  0x24   : > { %325 = vmatpush.bf16.msra.mxu0 %v561_v13 }
  0x25   : > { %338 = vmatpush.bf16.msra.mxu1 %v569_v14 }
  0x28   : > { %326 = vmatpush.bf16.msra.mxu0 %v560_v15 }
  0x29   : > { %339 = vmatpush.bf16.msra.mxu1 %v568_v16 }
  0x2c   : > { %327 = vmatpush.bf16.msra.mxu0 %v559_v17 }
  0x2d   : > { %340 = vmatpush.bf16.msra.mxu1 %v567_v18 }
  0x30   : > { %328 = vmatpush.bf16.msra.mxu0 %v558_v19 }
  0x31   : > { %341 = vmatpush.bf16.msra.mxu1 %v566_v20 }
  0x8f   : > { %v209_v21 = vpop.xlane.xlu0 %208 }
  0x90   : > { %614 = vrsqrt.f32 %v209_v21  ;;  %vm216_vm1 = vweird.f32 %v209_v21 }
  0x96   : > { %v615_v22 = vpop.eup %614 }
  0x97   : > { %v211_v23 = vmul.f32 %v615_v22, %v209_v21  ;;  %vm217_vm0 = vweird.f32 %v615_v22 }
  0x98   : > { %vm218_vm2 = vmor %vm216_vm1, %vm217_vm0 }
  0x99   : > { %v212_v24 = vmul.f32 %v615_v22, %v211_v23 }
  0x9b   : > { %v213_v25 = vmul.f32 0.5, %v212_v24 }
  0x9d   : > { %v214_v26 = vsub.f32 1.5, %v213_v25 }
  0x9f   : > { %v215_v27 = vmul.f32 %v615_v22, %v214_v26 }
  0xa1   : > { %v219_v28 = vsel %vm218_vm2, %v615_v22, %v215_v27 }
  0xa2   : > { %v220_v29 = vmin.f32 %v219_v28, 1e+12 }
  0xa4   : > { %v221_v30 = vmul.f32 %v220_v29, %v170_v4  ;;  %v222_v31 = vmul.f32 %v220_v29, %v171_v5 }
  0xa6   : > { %v223_v32 = vpack.c.bf16 %v221_v30, %v221_v30  ;;  %v224_v33 = vpack.c.bf16 %v222_v31, %v222_v31 }
  0xa8   : > { %329 = vmatmul.bf16.vlgmr.msra.gmra.mxu0 %v223_v32  ;;  %342 = vmatmul.bf16.vlgmr.msra.gmra.mxu1 %v224_v33 }
 0x125   : > { %v330_v34 = vpop.f32.mrf.mxu0  ;;  %v343_v35 = vpop.f32.mrf.mxu1 }
 0x126   : > { %v344_v36 = vadd.f32 %v343_v35, %v330_v34 }
 0x128   : > { %v348_v37 = vsel %vm347_vm3, %v344_v36, -inf }
 0x129   : > { %349 = vmax.xlane.f32.xlu0 %v348_v37 }
 0x12d   : > { %v332_v38 = vpop.f32.mrf.mxu0  ;;  %v345_v39 = vpop.f32.mrf.mxu1 }
 0x19c   : > { %v350_v40 = vpop.xlane.xlu0 %349 }
 0x19d   : > { %v351_v41 = vsub.f32 %v344_v36, %v350_v40 }
 0x19f   : > { %v352_v42 = vmul.f32 1.442695, %v351_v41 }
 0x1a1   : > { %616 = vpow2.f32 %v352_v42 }
 0x1a7   : > { %v617_v43 = vpop.eup %616 }
 0x1a8   : > { %v354_v44 = vsel %vm347_vm3, %v617_v43, 0.0 }
 0x1a9   : > { %355 = vadd.xlane.f32.xlu1 %v354_v44 }
 0x21c   : > { %v356_v52 = vpop.xlane.xlu1 %355 }
 0x21d   : > { %618 = vrcp.f32 %v356_v52 }
 0x223   : > { %v619_v53 = vpop.eup %618 }
 0x224   : > { %v358_v54 = vmul.f32 %v619_v53, %v617_v43 }
 0x226   : > { %v359_v55 = vpack.c.bf16 %v358_v54, %v358_v54 }
 0x228   : > { %550 = vmatmul.msk.bf16.vlgmr.msra.gmra.mxu2 %vm347_vm3, %v359_v55  ;;  %551 = vmatmul.msk.bf16.vlgmr.msra.gmra.mxu3 %vm347_vm3, %v359_v55 }
 0x2ab   : > { %v384_v56 = vpop.f32.mrf.mxu2  ;;  %v397_v57 = vpop.f32.mrf.mxu3 }
 0x2ac   : > { %401 = vst [vmem:[%s163_s6] sm:$0xff] %v384_v56 }
 0x2ad   : > { %402 = vst [vmem:[%s163_s6 + $0x8] sm:$0xff] %v397_v57 }
 0x2ae   : > { %647 = shalt.err (!%p644_p3)
}
 0x2af   : > { %575 = dma.vmem_to_hbm [thread:$0]  (%p742_p5), %s418_s7, 256, %s420_s8, %s404_s9  }
 0x2b3   : > { %v386_v58 = vpop.f32.mrf.mxu2  ;;  %v399_v59 = vpop.f32.mrf.mxu3 }
 0x2b4 PF: > { %p581_p4 = scmp.ge.s32.totalorder %s682_s15, 2  ;;  %s431_s25 = sand.u32 1, %s670_s12  }
 0x2b5   : > { %s432_s26 = scalar_lea.sflag [#allocation3], %s431_s25 }
 0x2b6   : > { %p578_p7 = pnand %p581_p4, %p746_p6 }
 0x2b8   : > { %p579_p8 = pneg %p578_p7 }
 0x2ba   : > { %665 = dma.done.wait (%p579_p8), %s432_s26, 256  }
 0x2bb   : > { %667 = vsyncadd (%p579_p8), %s432_s26, 4294967040  ;;  %p13_p5 = scmp.ge.s32.totalorder %s729_s18, 4   ;;  %s850_s12 = smov %s674_s13 }
 0x2bc   : > { %s851_s13 = smov %s678_s14  ;;  %s852_s14 = smov %s740_s21 }
 0x2bd   : > { %s853_s15 = smov %s729_s18  ;;  %15 = sbr.rel (!%p13_p5) target bundleno = 3 (0x3), region = 67 }
 0x2c2   :  { %438 = vsyncpa [#allocation3], 1 }
 0x2c3   :  { %440 = vsyncpa [#allocation3 + $0x1], 1 }

</bundles_post_ra>
